<compile_context>
chip_gen: v5e
topology: v5e:2x2
jax: 0.10.0
libtpu: 0.0.40
codegen_flags: <defaults>
</compile_context>

<pallas_src>
import functools
import math

import jax
import jax.numpy as jnp
from jax.experimental import pallas as pl
from jax.experimental.pallas import tpu as pltpu

_LANE = 128  # feature axes padded to multiples of the 128-lane vreg width

_ACTIVATIONS = {
    "ReLU": lambda y: jnp.maximum(y, 0.0),
    "Tanh": jnp.tanh,
    "Sigmoid": jax.nn.sigmoid,
    "GELU": jax.nn.gelu,
    "SiLU": jax.nn.silu,
}
# TODO(synk): only the activation names above are mapped; other torch.nn
# activation_name strings would need explicit jnp equivalents.


# ----------------------------------------------------------------------------
# small helpers
# ----------------------------------------------------------------------------
def _round_up(x: int, m: int) -> int:
    return (x + m - 1) // m * m


def _sublane(dtype) -> int:
    # f32 sublane tile = 8 rows; 16-bit dtypes pack 2 rows per sublane -> 16.
    return 16 if jnp.dtype(dtype).itemsize == 2 else 8


def _choose_tm(m: int, sublane: int) -> int:
    """Batch tile: sublane multiple; when possible >=2 grid steps on the
    parallel axis so v7x's two TensorCores both get work."""
    m_s = _round_up(m, sublane)
    if m_s <= sublane:
        return sublane
    if m_s <= 256:
        return _round_up((m_s + 1) // 2, sublane)
    return 128


def _pad2d(a: jax.Array, rows: int, cols: int) -> jax.Array:
    r, c = a.shape
    if r == rows and c == cols:
        return a
    return jnp.pad(a, ((0, rows - r), (0, cols - c)))


def _vmem_limit(needed_bytes: int) -> int:
    # Explicit scoped-VMEM request: 2x headroom, floor 32 MiB, cap 48 MiB so
    # the plan also fits v7x's 64 MiB physical VMEM per TensorCore.
    return int(min(max(2 * needed_bytes, 32 * 1024 * 1024), 48 * 1024 * 1024))


# ----------------------------------------------------------------------------
# Kernel 1: whole-MLP fusion (all weights resident in VMEM)
# ----------------------------------------------------------------------------
def _mlp_fused_kernel(*refs, num_layers: int, activation):
    # refs = (x_ref, w0_ref, b0_ref, w1_ref, b1_ref, ..., o_ref)
    x_ref, o_ref = refs[0], refs[-1]
    h = x_ref[...]
    for layer in range(num_layers):
        w_ref = refs[1 + 2 * layer]
        b_ref = refs[2 + 2 * layer]
        y = jnp.dot(h.astype(w_ref.dtype), w_ref[...],
                    preferred_element_type=jnp.float32)
        y = y + b_ref[...]          # (1, N) broadcast over rows, f32
        h = activation(y)           # f32 intermediate; recast next iteration
    o_ref[...] = h.astype(o_ref.dtype)


def mlp_forward_fused(x, params, *, activation_name="ReLU",
                      compute_dtype=jnp.float32):
    act = _ACTIVATIONS[activation_name]
    M, d_in = x.shape
    dims = [d_in] + [w.shape[1] for (w, _) in params]
    d_pad = [_round_up(d, _LANE) for d in dims]

    sub = _sublane(compute_dtype)
    tm = _choose_tm(M, sub)
    m_pad = _round_up(M, tm)

    x_p = _pad2d(x.astype(compute_dtype), m_pad, d_pad[0])
    ins = [x_p]
    in_specs = [pl.BlockSpec((tm, d_pad[0]), lambda i: (i, 0))]
    for layer, (w, b) in enumerate(params):
        w_p = _pad2d(w.astype(compute_dtype), d_pad[layer], d_pad[layer + 1])
        b_p = _pad2d(b.reshape(1, -1).astype(jnp.float32), 1, d_pad[layer + 1])
        ins += [w_p, b_p]
        in_specs += [
            pl.BlockSpec((d_pad[layer], d_pad[layer + 1]), lambda i: (0, 0)),
            pl.BlockSpec((1, d_pad[layer + 1]), lambda i: (0, 0)),
        ]
    out_specs = pl.BlockSpec((tm, d_pad[-1]), lambda i: (i, 0))

    itemsize = jnp.dtype(compute_dtype).itemsize
    param_bytes = sum(int(a.size) * a.dtype.itemsize for a in ins[1:])
    vmem_needed = (2 * tm * d_pad[0] * itemsize          # x (double-buffered)
                   + 2 * tm * d_pad[-1] * 4              # out (double-buffered)
                   + 2 * param_bytes                     # resident params
                   + 4 * tm * max(d_pad) * 4)            # intermediate headroom
    flops = int(sum(2 * m_pad * d_pad[l] * d_pad[l + 1]
                    for l in range(len(params))))
    bytes_accessed = int(sum(int(a.size) * a.dtype.itemsize for a in ins)
                         + m_pad * d_pad[-1] * 4)

    kernel = functools.partial(_mlp_fused_kernel,
                               num_layers=len(params), activation=act)
    out = pl.pallas_call(
        kernel,
        out_shape=jax.ShapeDtypeStruct((m_pad, d_pad[-1]), jnp.float32),
        grid_spec=pltpu.PrefetchScalarGridSpec(
            num_scalar_prefetch=0,
            grid=(m_pad // tm,),
            in_specs=in_specs,
            out_specs=out_specs,
        ),
        compiler_params=pltpu.CompilerParams(
            dimension_semantics=("parallel",),
            vmem_limit_bytes=_vmem_limit(vmem_needed),
        ),
        cost_estimate=pl.CostEstimate(
            flops=flops, transcendentals=0, bytes_accessed=bytes_accessed),
    )(*ins)
    return out[:M, :dims[-1]]


# ----------------------------------------------------------------------------
# Kernel 2: tiled single layer (fallback for layers too big for full residency)
# grid = (M//tm, N//tn, K//tk) with an f32 VMEM accumulator.
# ----------------------------------------------------------------------------
def _linear_act_kernel(x_ref, w_ref, b_ref, o_ref, acc_ref, *, activation):
    k = pl.program_id(2)

    @pl.when(k == 0)
    def _():
        acc_ref[...] = jnp.zeros_like(acc_ref)

    acc_ref[...] += jnp.dot(x_ref[...], w_ref[...],
                            preferred_element_type=jnp.float32)

    @pl.when(k == pl.num_programs(2) - 1)
    def _():
        y = acc_ref[...] + b_ref[...]
        o_ref[...] = activation(y).astype(o_ref.dtype)


def linear_act_tiled(x, w, b, *, activation, compute_dtype=jnp.float32):
    M, K = x.shape
    K2, N = w.shape
    assert K == K2, (K, K2)

    k_pad = _round_up(K, _LANE)
    n_pad = _round_up(N, _LANE)
    sub = _sublane(compute_dtype)
    tm = _choose_tm(M, sub)
    m_pad = _round_up(M, tm)
    tn = 256 if n_pad % 256 == 0 else 128
    tk = 512 if k_pad % 512 == 0 else (256 if k_pad % 256 == 0 else 128)

    x_p = _pad2d(x.astype(compute_dtype), m_pad, k_pad)
    w_p = _pad2d(w.astype(compute_dtype), k_pad, n_pad)
    b_p = _pad2d(b.reshape(1, -1).astype(jnp.float32), 1, n_pad)

    itemsize = jnp.dtype(compute_dtype).itemsize
    vmem_needed = (2 * (tm * tk + tk * tn) * itemsize    # x/w tiles, dbl-buffered
                   + 2 * tm * tn * 4                     # out tile, dbl-buffered
                   + 2 * tn * 4                          # bias tile
                   + tm * tn * 4)                        # accumulator scratch
    flops = int(2 * m_pad * k_pad * n_pad)
    bytes_accessed = int(x_p.size * itemsize + w_p.size * itemsize
                         + b_p.size * 4 + m_pad * n_pad * 4)

    out = pl.pallas_call(
        functools.partial(_linear_act_kernel, activation=activation),
        out_shape=jax.ShapeDtypeStruct((m_pad, n_pad), jnp.float32),
        grid_spec=pltpu.PrefetchScalarGridSpec(
            num_scalar_prefetch=0,
            grid=(m_pad // tm, n_pad // tn, k_pad // tk),
            in_specs=[
                pl.BlockSpec((tm, tk), lambda i, j, k: (i, k)),
                pl.BlockSpec((tk, tn), lambda i, j, k: (k, j)),
                pl.BlockSpec((1, tn), lambda i, j, k: (0, j)),
            ],
            out_specs=pl.BlockSpec((tm, tn), lambda i, j, k: (i, j)),
            scratch_shapes=[pltpu.VMEM((tm, tn), jnp.float32)],
        ),
        compiler_params=pltpu.CompilerParams(
            dimension_semantics=("parallel", "parallel", "arbitrary"),
            vmem_limit_bytes=_vmem_limit(vmem_needed),
        ),
        cost_estimate=pl.CostEstimate(
            flops=flops, transcendentals=0, bytes_accessed=bytes_accessed),
    )(x_p, w_p, b_p)
    return out[:M, :N]


# ----------------------------------------------------------------------------
# Parameters + forward (matches MLP.forward: activation after every Linear)
# ----------------------------------------------------------------------------
def init_mlp_params(key, layer_sizes, bias=True):
    """nn.Linear-style init U(-1/sqrt(fan_in), 1/sqrt(fan_in)); W stored [in, out]."""
    params = []
    for i in range(len(layer_sizes) - 1):
        fan_in, fan_out = layer_sizes[i], layer_sizes[i + 1]
        key, kw, kb = jax.random.split(key, 3)
        bound = 1.0 / math.sqrt(fan_in)
        w = jax.random.uniform(kw, (fan_in, fan_out), jnp.float32, -bound, bound)
        b = (jax.random.uniform(kb, (fan_out,), jnp.float32, -bound, bound)
             if bias else jnp.zeros((fan_out,), jnp.float32))
        params.append((w, b))
    return params


def mlp_forward(x, params, *, activation_name="ReLU",
                compute_dtype=jnp.float32, force_tiled=False,
                fused_vmem_budget=24 * 1024 * 1024):
    """Matches MLP.forward. Fuses the whole stack into one pallas_call when the
    padded parameters fit comfortably in VMEM; otherwise runs one tiled
    pallas_call per layer."""
    act = _ACTIVATIONS[activation_name]
    if not force_tiled:
        itemsize = jnp.dtype(compute_dtype).itemsize
        dims = [x.shape[1]] + [w.shape[1] for (w, _) in params]
        d_pad = [_round_up(d, _LANE) for d in dims]
        wb_bytes = sum(d_pad[l] * d_pad[l + 1] * itemsize + d_pad[l + 1] * 4
                       for l in range(len(params)))
        if 2 * wb_bytes <= fused_vmem_budget:
            return mlp_forward_fused(x, params,
                                     activation_name=activation_name,
                                     compute_dtype=compute_dtype)
    h = x
    for (w, b) in params:
        h = linear_act_tiled(h, w, b, activation=act,
                             compute_dtype=compute_dtype)
    return h


def mlp_reference(x, params, activation_name="ReLU"):
    act = _ACTIVATIONS[activation_name]
    h = x
    for (w, b) in params:
        h = act(h @ w + b)
    return h


# ----------------------------------------------------------------------------
# Self-test
# ----------------------------------------------------------------------------
if __name__ == "__main__":
    # Small shapes consistent with the module: MLP([32, 64, 32, 16]), batch=8.
    layer_sizes = [32, 64, 32, 16]
    batch = 8

    key = jax.random.PRNGKey(0)
    k_x, k_p = jax.random.split(key)
    x = jax.random.normal(k_x, (batch, layer_sizes[0]), dtype=jnp.float32)
    params = init_mlp_params(k_p, layer_sizes)
    ref = mlp_reference(x, params)

    # 1) fused whole-MLP kernel, f32 operands.
    out_f32 = jax.block_until_ready(
        mlp_forward(x, params, compute_dtype=jnp.float32))
    assert out_f32.shape == (batch, layer_sizes[-1])
    assert jnp.allclose(out_f32, ref, atol=1e-5, rtol=1e-5)

    # 2) fused whole-MLP kernel, bf16 operands / f32 accumulation (v6e/v7x MXU path).
    out_bf16 = jax.block_until_ready(
        mlp_forward(x, params, compute_dtype=jnp.bfloat16))
    assert out_bf16.shape == (batch, layer_sizes[-1])
    assert jnp.allclose(out_bf16, ref, atol=5e-2, rtol=5e-2)

    # 3) tiled per-layer path (forced) on larger layers — exercises M/N/K tiling,
    #    the f32 accumulator, and pl.when init/finalize.
    big_sizes = [256, 512, 128]
    kb_x, kb_p = jax.random.split(jax.random.PRNGKey(1))
    xb = jax.random.normal(kb_x, (256, big_sizes[0]), dtype=jnp.float32)
    pb = init_mlp_params(kb_p, big_sizes)
    refb = mlp_reference(xb, pb)
    outb = jax.block_until_ready(
        mlp_forward(xb, pb, compute_dtype=jnp.bfloat16, force_tiled=True))
    assert outb.shape == (256, big_sizes[-1])
    assert jnp.allclose(outb, refb, atol=5e-2, rtol=5e-2)

    print("KERNEL_OK")
</pallas_src>

<mosaic_0001>
module attributes {stable_mosaic.version = 11 : i64} {
  func.func @_mlp_fused_kernel(%arg0: i32, %arg1: memref<8x128xf32, #tpu.memory_space<vmem>>, %arg2: memref<128x128xf32, #tpu.memory_space<vmem>>, %arg3: memref<1x128xf32, #tpu.memory_space<vmem>>, %arg4: memref<128x128xf32, #tpu.memory_space<vmem>>, %arg5: memref<1x128xf32, #tpu.memory_space<vmem>>, %arg6: memref<128x128xf32, #tpu.memory_space<vmem>>, %arg7: memref<1x128xf32, #tpu.memory_space<vmem>>, %arg8: memref<8x128xf32, #tpu.memory_space<vmem>>) attributes {dimension_semantics = [#tpu.dimension_semantics<parallel>], iteration_bounds = array<i64: 1>, scalar_prefetch = 0 : i64, scratch_operands = 0 : i64, tpu.core_type = #tpu.core_type<tc>, window_params = [{transform_indices = @transform_0, window_bounds = array<i64: 8, 128>}, {pipeline_mode = #tpu.pipeline_mode<synchronous>, transform_indices = @transform_1, window_bounds = array<i64: 128, 128>}, {pipeline_mode = #tpu.pipeline_mode<synchronous>, transform_indices = @transform_2, window_bounds = array<i64: 1, 128>}, {pipeline_mode = #tpu.pipeline_mode<synchronous>, transform_indices = @transform_3, window_bounds = array<i64: 128, 128>}, {pipeline_mode = #tpu.pipeline_mode<synchronous>, transform_indices = @transform_4, window_bounds = array<i64: 1, 128>}, {pipeline_mode = #tpu.pipeline_mode<synchronous>, transform_indices = @transform_5, window_bounds = array<i64: 128, 128>}, {pipeline_mode = #tpu.pipeline_mode<synchronous>, transform_indices = @transform_6, window_bounds = array<i64: 1, 128>}, {transform_indices = @transform_7, window_bounds = array<i64: 8, 128>}]} {
    %c0 = arith.constant 0 : index
    %c0_0 = arith.constant 0 : index
    %0 = vector.load %arg1[%c0, %c0_0] : memref<8x128xf32, #tpu.memory_space<vmem>>, vector<8x128xf32>
    %c0_1 = arith.constant 0 : index
    %c0_2 = arith.constant 0 : index
    %1 = vector.load %arg2[%c0_1, %c0_2] : memref<128x128xf32, #tpu.memory_space<vmem>>, vector<128x128xf32>
    %cst = arith.constant dense<0.000000e+00> : vector<8x128xf32>
    %2 = tpu.matmul %0, %1, %cst {dimension_numbers = #tpu.dot_dimension_numbers<[1], [0], [0], [1], [0, 0, 1, 1], [], []>} : vector<8x128xf32>, vector<128x128xf32>, vector<8x128xf32> -> vector<8x128xf32>
    %c0_3 = arith.constant 0 : index
    %c0_4 = arith.constant 0 : index
    %3 = vector.load %arg3[%c0_3, %c0_4] : memref<1x128xf32, #tpu.memory_space<vmem>>, vector<1x128xf32>
    %4 = vector.broadcast %3 : vector<1x128xf32> to vector<8x128xf32>
    %5 = arith.addf %2, %4 : vector<8x128xf32>
    %cst_5 = arith.constant 0.000000e+00 : f32
    %6 = vector.broadcast %cst_5 : f32 to vector<8x128xf32>
    %7 = arith.maximumf %5, %6 : vector<8x128xf32>
    %c0_6 = arith.constant 0 : index
    %c0_7 = arith.constant 0 : index
    %8 = vector.load %arg4[%c0_6, %c0_7] : memref<128x128xf32, #tpu.memory_space<vmem>>, vector<128x128xf32>
    %cst_8 = arith.constant dense<0.000000e+00> : vector<8x128xf32>
    %9 = tpu.matmul %7, %8, %cst_8 {dimension_numbers = #tpu.dot_dimension_numbers<[1], [0], [0], [1], [0, 0, 1, 1], [], []>} : vector<8x128xf32>, vector<128x128xf32>, vector<8x128xf32> -> vector<8x128xf32>
    %c0_9 = arith.constant 0 : index
    %c0_10 = arith.constant 0 : index
    %10 = vector.load %arg5[%c0_9, %c0_10] : memref<1x128xf32, #tpu.memory_space<vmem>>, vector<1x128xf32>
    %11 = vector.broadcast %10 : vector<1x128xf32> to vector<8x128xf32>
    %12 = arith.addf %9, %11 : vector<8x128xf32>
    %cst_11 = arith.constant 0.000000e+00 : f32
    %13 = vector.broadcast %cst_11 : f32 to vector<8x128xf32>
    %14 = arith.maximumf %12, %13 : vector<8x128xf32>
    %c0_12 = arith.constant 0 : index
    %c0_13 = arith.constant 0 : index
    %15 = vector.load %arg6[%c0_12, %c0_13] : memref<128x128xf32, #tpu.memory_space<vmem>>, vector<128x128xf32>
    %cst_14 = arith.constant dense<0.000000e+00> : vector<8x128xf32>
    %16 = tpu.matmul %14, %15, %cst_14 {dimension_numbers = #tpu.dot_dimension_numbers<[1], [0], [0], [1], [0, 0, 1, 1], [], []>} : vector<8x128xf32>, vector<128x128xf32>, vector<8x128xf32> -> vector<8x128xf32>
    %c0_15 = arith.constant 0 : index
    %c0_16 = arith.constant 0 : index
    %17 = vector.load %arg7[%c0_15, %c0_16] : memref<1x128xf32, #tpu.memory_space<vmem>>, vector<1x128xf32>
    %18 = vector.broadcast %17 : vector<1x128xf32> to vector<8x128xf32>
    %19 = arith.addf %16, %18 : vector<8x128xf32>
    %cst_17 = arith.constant 0.000000e+00 : f32
    %20 = vector.broadcast %cst_17 : f32 to vector<8x128xf32>
    %21 = arith.maximumf %19, %20 : vector<8x128xf32>
    %c0_18 = arith.constant 0 : index
    %c0_19 = arith.constant 0 : index
    %22 = vector.load %arg8[%c0_18, %c0_19] : memref<8x128xf32, #tpu.memory_space<vmem>>, vector<8x128xf32>
    tpu.vector_store %arg8[%c0_18, %c0_19], %21 {strides = array<i32>} : memref<8x128xf32, #tpu.memory_space<vmem>>, vector<8x128xf32>,
    return
  }
  func.func @transform_0(%arg0: i32) -> (i32, i32) {
    %c0_i32 = arith.constant 0 : i32
    %c0_i32_0 = arith.constant 0 : i32
    return %arg0, %c0_i32 : i32, i32
  }
  func.func @transform_1(%arg0: i32) -> (i32, i32) {
    %c0_i32 = arith.constant 0 : i32
    %c0_i32_0 = arith.constant 0 : i32
    %c0_i32_1 = arith.constant 0 : i32
    return %c0_i32, %c0_i32_0 : i32, i32
  }
  func.func @transform_2(%arg0: i32) -> (i32, i32) {
    %c0_i32 = arith.constant 0 : i32
    %c0_i32_0 = arith.constant 0 : i32
    %c0_i32_1 = arith.constant 0 : i32
    return %c0_i32, %c0_i32_0 : i32, i32
  }
  func.func @transform_3(%arg0: i32) -> (i32, i32) {
    %c0_i32 = arith.constant 0 : i32
    %c0_i32_0 = arith.constant 0 : i32
    %c0_i32_1 = arith.constant 0 : i32
    return %c0_i32, %c0_i32_0 : i32, i32
  }
  func.func @transform_4(%arg0: i32) -> (i32, i32) {
    %c0_i32 = arith.constant 0 : i32
    %c0_i32_0 = arith.constant 0 : i32
    %c0_i32_1 = arith.constant 0 : i32
    return %c0_i32, %c0_i32_0 : i32, i32
  }
  func.func @transform_5(%arg0: i32) -> (i32, i32) {
    %c0_i32 = arith.constant 0 : i32
    %c0_i32_0 = arith.constant 0 : i32
    %c0_i32_1 = arith.constant 0 : i32
    return %c0_i32, %c0_i32_0 : i32, i32
  }
  func.func @transform_6(%arg0: i32) -> (i32, i32) {
    %c0_i32 = arith.constant 0 : i32
    %c0_i32_0 = arith.constant 0 : i32
    %c0_i32_1 = arith.constant 0 : i32
    return %c0_i32, %c0_i32_0 : i32, i32
  }
  func.func @transform_7(%arg0: i32) -> (i32, i32) {
    %c0_i32 = arith.constant 0 : i32
    %c0_i32_0 = arith.constant 0 : i32
    return %arg0, %c0_i32 : i32, i32
  }
}

</mosaic_0001>

<bundles_post_ra>
// kernel: tpu_custom_call.1
= control target key start
LH: loop header
LB: loop body
LE: loop exit
PB: predicated region body
PF: predicated region fallthrough
CT: control target
= control target key end

     0   :  { %12 = vsyncpa [#allocation3], 0  ;;  %s441_s0 = inlined_call_operand.hbm [shape: f32[8,128], index: 0, kind: input, shape index: {}]   ;;  %s442_s1 = inlined_call_operand.hbm [shape: f32[128,128], index: 1, kind: input, shape index: {}]   ;;  %s443_s2 = inlined_call_operand.vmem [shape: f32[1,128], index: 2, kind: input, shape index: {}]   ;;  %s444_s3 = inlined_call_operand.hbm [shape: f32[128,128], index: 3, kind: input, shape index: {}]   ;;  %s445_s4 = inlined_call_operand.vmem [shape: f32[1,128], index: 4, kind: input, shape index: {}]   ;;  %s446_s5 = inlined_call_operand.hbm [shape: f32[128,128], index: 5, kind: input, shape index: {}]   ;;  %s447_s6 = inlined_call_operand.vmem [shape: f32[1,128], index: 6, kind: input, shape index: {}]   ;;  %s448_s7 = inlined_call_operand.hbm [shape: f32[8,128], index: 7, kind: output, shape index: {}]  }
   0x1   :  { %13 = vsyncpa [#allocation6], 0 }
   0x2   :  { %14 = vsyncpa [#allocation9], 0  ;;  %s31_s26 = sshll.u32 %s442_s1, 4  ;;  %s32_s26 = int_to_ptr.hbm [resolvable:$true] %s31_s26 }
   0x3   :  { %15 = vsyncpa [#allocation4], 0  ;;  %s370_s27 = smov [#allocation5]   ;;  %s21_s8 = sshll.u32 %s441_s0, 4  ;;  %s22_s8 = int_to_ptr.hbm [resolvable:$true] %s21_s8 }
   0x4   :  { %s33_s28 = sshll.u32 %s370_s27, 4  ;;  %s371_s9 = smov 128   ;;  %s34_s28 = int_to_ptr.vmem [resolvable:$true] %s33_s28 }
   0x5   :  { %s372_s10 = smov 8   ;;  %s373_s11 = smov [#allocation2]  }
   0x6   :  { %39 = dma.hbm_to_vmem [thread:$0]  %s32_s26, 2048, %s34_s28, [#allocation6], %s371_s9, %s371_s9, %s372_s10  }
   0x7   :  { %s23_s12 = sshll.u32 %s373_s11, 4  ;;  %s46_s15 = sshll.u32 %s444_s3, 4  ;;  %s24_s12 = int_to_ptr.vmem [resolvable:$true] %s23_s12  ;;  %s47_s15 = int_to_ptr.hbm [resolvable:$true] %s46_s15 }
   0x8   :  { %26 = dma.hbm_to_vmem [thread:$0]  %s22_s8, 128, %s24_s12, [#allocation3]  }
   0x9   :  { %s61_s17 = sshll.u32 %s446_s5, 4  ;;  %s374_s18 = smov [#allocation7]   ;;  %s62_s17 = int_to_ptr.hbm [resolvable:$true] %s61_s17 }
   0xa   :  { %s48_s19 = sshll.u32 %s374_s18, 4  ;;  %s375_s0 = smov [#allocation8]   ;;  %s49_s19 = int_to_ptr.vmem [resolvable:$true] %s48_s19 }
   0xb   :  { %54 = dma.hbm_to_vmem [thread:$0]  %s47_s15, 2048, %s49_s19, [#allocation6], %s371_s9, %s371_s9, %s372_s10  }
   0xc   :  { %s63_s20 = sshll.u32 %s375_s0, 4  ;;  %s64_s20 = int_to_ptr.vmem [resolvable:$true] %s63_s20 }
   0xd   :  { %69 = dma.hbm_to_vmem [thread:$0]  %s62_s17, 2048, %s64_s20, [#allocation9], %s371_s9, %s371_s9, %s372_s10  }
   0xe   :  { %362 = dma.done.wait [#allocation3], 128  }
   0xf   :  { %363 = vsyncadd [#allocation3], 4294967168 }
  0x10   :  { %364 = dma.done.wait [#allocation6], 4096  }
  0x11   :  { %365 = vsyncadd [#allocation6], 4294963200 }
  0x12   :  { %366 = dma.done.wait [#allocation9], 2048  }
  0x13   :  { %367 = vsyncadd [#allocation9], 4294965248  ;;  %v104_v0 = vld [vmem:[#allocation5 + $0x78] sm:$0xff]  ;;  %v103_v1 = vld [vmem:[#allocation5 + $0x70] sm:$0xff]  ;;  %s376_s24 = smov [#allocation10]   ;;  %s220_s28 = sshll.u32 %s448_s7, 4  ;;  %s221_s28 = int_to_ptr.hbm [resolvable:$true] %s220_s28 }
  0x14   :  { %109 = vmatpush.msra.mxu0 %v104_v0  ;;  %v102_v2 = vld [vmem:[#allocation5 + $0x68] sm:$0xff]  ;;  %v101_v3 = vld [vmem:[#allocation5 + $0x60] sm:$0xff]  ;;  %v145_v4 = vld [vmem:[#allocation7 + $0x78] sm:$0xff]  ;;  %s218_s25 = sshll.u32 %s376_s24, 4  ;;  %s219_s25 = int_to_ptr.vmem [resolvable:$true] %s218_s25 }
  0x15   :  { %v100_v5 = vld [vmem:[#allocation5 + $0x58] sm:$0xff]  ;;  %150 = vmatpush.msra.mxu1 %v145_v4  ;;  %v144_v6 = vld [vmem:[#allocation7 + $0x70] sm:$0xff]  ;;  %v143_v7 = vld [vmem:[#allocation7 + $0x68] sm:$0xff] }
  0x16   :  { %110 = vmatpush.msra.mxu0 %v103_v1  ;;  %v99_v8 = vld [vmem:[#allocation5 + $0x50] sm:$0xff]  ;;  %v142_v9 = vld [vmem:[#allocation7 + $0x60] sm:$0xff]  ;;  %v98_v10 = vld [vmem:[#allocation5 + $0x48] sm:$0xff] }
  0x17   :  { %151 = vmatpush.msra.mxu1 %v144_v6  ;;  %v141_v11 = vld [vmem:[#allocation7 + $0x58] sm:$0xff]  ;;  %v97_v12 = vld [vmem:[#allocation5 + $0x40] sm:$0xff]  ;;  %v140_v13 = vld [vmem:[#allocation7 + $0x50] sm:$0xff] }
  0x18   :  { %111 = vmatpush.msra.mxu0 %v102_v2  ;;  %v96_v14 = vld [vmem:[#allocation5 + $0x38] sm:$0xff]  ;;  %v139_v15 = vld [vmem:[#allocation7 + $0x48] sm:$0xff]  ;;  %v95_v16 = vld [vmem:[#allocation5 + $0x30] sm:$0xff] }
  0x19   :  { %152 = vmatpush.msra.mxu1 %v143_v7  ;;  %v138_v17 = vld [vmem:[#allocation7 + $0x40] sm:$0xff]  ;;  %v94_v18 = vld [vmem:[#allocation5 + $0x28] sm:$0xff]  ;;  %v137_v19 = vld [vmem:[#allocation7 + $0x38] sm:$0xff] }
  0x1a   :  { %112 = vmatpush.msra.mxu0 %v101_v3  ;;  %v93_v20 = vld [vmem:[#allocation5 + $0x20] sm:$0xff]  ;;  %v136_v21 = vld [vmem:[#allocation7 + $0x30] sm:$0xff]  ;;  %v92_v22 = vld [vmem:[#allocation5 + $0x18] sm:$0xff] }
  0x1b   :  { %153 = vmatpush.msra.mxu1 %v142_v9  ;;  %v135_v23 = vld [vmem:[#allocation7 + $0x28] sm:$0xff]  ;;  %v91_v24 = vld [vmem:[#allocation5 + $0x10] sm:$0xff]  ;;  %v134_v25 = vld [vmem:[#allocation7 + $0x20] sm:$0xff] }
  0x1c   :  { %113 = vmatpush.msra.mxu0 %v100_v5  ;;  %v90_v26 = vld [vmem:[#allocation5 + $0x8] sm:$0xff]  ;;  %v133_v27 = vld [vmem:[#allocation7 + $0x18] sm:$0xff]  ;;  %v89_v28 = vld [vmem:[#allocation5] sm:$0xff] }
  0x1d   :  { %154 = vmatpush.msra.mxu1 %v141_v11  ;;  %v88_v29 = vld [vmem:[#allocation2] sm:$0xff]  ;;  %v132_v30 = vld [vmem:[#allocation7 + $0x10] sm:$0xff]  ;;  %v131_v31 = vld [vmem:[#allocation7 + $0x8] sm:$0xff] }
  0x1e   :  { %114 = vmatpush.msra.mxu0 %v99_v8  ;;  %v130_v32 = vld [vmem:[#allocation7] sm:$0xff]  ;;  %v186_v33 = vld [vmem:[#allocation8 + $0x78] sm:$0xff]  ;;  %v185_v34 = vld [vmem:[#allocation8 + $0x70] sm:$0xff] }
  0x1f   :  { %155 = vmatpush.msra.mxu1 %v140_v13  ;;  %191 = vmatpush.msra.mxu2 %v186_v33  ;;  %v184_v35 = vld [vmem:[#allocation8 + $0x68] sm:$0xff]  ;;  %v183_v36 = vld [vmem:[#allocation8 + $0x60] sm:$0xff]  ;;  %v182_v37 = vld [vmem:[#allocation8 + $0x58] sm:$0xff] }
  0x20   :  { %115 = vmatpush.msra.mxu0 %v98_v10  ;;  %v181_v38 = vld [vmem:[#allocation8 + $0x50] sm:$0xff]  ;;  %v180_v39 = vld [vmem:[#allocation8 + $0x48] sm:$0xff]  ;;  %v179_v40 = vld [vmem:[#allocation8 + $0x40] sm:$0xff] }
  0x21   :  { %156 = vmatpush.msra.mxu1 %v139_v15  ;;  %192 = vmatpush.msra.mxu2 %v185_v34  ;;  %v178_v41 = vld [vmem:[#allocation8 + $0x38] sm:$0xff]  ;;  %v177_v42 = vld [vmem:[#allocation8 + $0x30] sm:$0xff]  ;;  %v176_v43 = vld [vmem:[#allocation8 + $0x28] sm:$0xff] }
  0x22   :  { %116 = vmatpush.msra.mxu0 %v97_v12  ;;  %v175_v44 = vld [vmem:[#allocation8 + $0x20] sm:$0xff]  ;;  %v174_v45 = vld [vmem:[#allocation8 + $0x18] sm:$0xff]  ;;  %v173_v50 = vld [vmem:[#allocation8 + $0x10] sm:$0xff] }
  0x23   :  { %157 = vmatpush.msra.mxu1 %v138_v17  ;;  %193 = vmatpush.msra.mxu2 %v184_v35  ;;  %v239_v46 = vld [vmem:[%s443_s2] ss:$0 sm:$0xff]  ;;  %v172_v51 = vld [vmem:[#allocation8 + $0x8] sm:$0xff]  ;;  %v171_v52 = vld [vmem:[#allocation8] sm:$0xff] }
  0x24   :  { %117 = vmatpush.msra.mxu0 %v96_v14  ;;  %v240_v53 = vld [vmem:[%s445_s4] ss:$0 sm:$0xff] }
  0x25   :  { %158 = vmatpush.msra.mxu1 %v137_v19  ;;  %194 = vmatpush.msra.mxu2 %v183_v36  ;;  %v241_v57 = vld [vmem:[%s447_s6] ss:$0 sm:$0xff] }
  0x26   :  { %118 = vmatpush.msra.mxu0 %v95_v16 }
  0x27   :  { %159 = vmatpush.msra.mxu1 %v136_v21  ;;  %195 = vmatpush.msra.mxu2 %v182_v37 }
  0x28   :  { %119 = vmatpush.msra.mxu0 %v94_v18 }
  0x29   :  { %160 = vmatpush.msra.mxu1 %v135_v23  ;;  %196 = vmatpush.msra.mxu2 %v181_v38 }
  0x2a   :  { %120 = vmatpush.msra.mxu0 %v93_v20 }
  0x2b   :  { %161 = vmatpush.msra.mxu1 %v134_v25  ;;  %197 = vmatpush.msra.mxu2 %v180_v39 }
  0x2c   :  { %121 = vmatpush.msra.mxu0 %v92_v22 }
  0x2d   :  { %162 = vmatpush.msra.mxu1 %v133_v27  ;;  %198 = vmatpush.msra.mxu2 %v179_v40 }
  0x2e   :  { %122 = vmatpush.msra.mxu0 %v91_v24 }
  0x2f   :  { %163 = vmatpush.msra.mxu1 %v132_v30  ;;  %199 = vmatpush.msra.mxu2 %v178_v41 }
  0x30   :  { %123 = vmatpush.msra.mxu0 %v90_v26 }
  0x31   :  { %164 = vmatpush.msra.mxu1 %v131_v31  ;;  %200 = vmatpush.msra.mxu2 %v177_v42 }
  0x32   :  { %124 = vmatpush.msra.mxu0 %v89_v28 }
  0x33   :  { %125 = vmatmul.f32.vlgmr.msra.gmra.mxu0 %v88_v29  ;;  %165 = vmatpush.msra.mxu1 %v130_v32 }
  0x34   :  { %201 = vmatpush.msra.mxu2 %v176_v43 }
  0x36   :  { %202 = vmatpush.msra.mxu2 %v175_v44 }
  0x38   :  { %203 = vmatpush.msra.mxu2 %v174_v45 }
  0x3a   :  { %204 = vmatpush.msra.mxu2 %v173_v50 }
  0x3c   :  { %205 = vmatpush.msra.mxu2 %v172_v51 }
  0x3e   :  { %206 = vmatpush.msra.mxu2 %v171_v52 }
  0xb0   :  { %v126_v47 = vpop.f32.mrf.mxu0 }
  0xb1   :  { %v127_v48 = vadd.f32 %v239_v46, %v126_v47 }
  0xb3   :  { %v129_v49 = vmax.f32 %v127_v48, 0.0 }
  0xb5   :  { %166 = vmatmul.f32.vlgmr.msra.gmra.mxu1 %v129_v49 }
 0x132   :  { %v167_v54 = vpop.f32.mrf.mxu1 }
 0x133   :  { %v168_v55 = vadd.f32 %v240_v53, %v167_v54 }
 0x135   :  { %v170_v56 = vmax.f32 %v168_v55, 0.0 }
 0x137   :  { %207 = vmatmul.f32.vlgmr.msra.gmra.mxu2 %v170_v56 }
 0x1ba   :  { %v208_v58 = vpop.f32.mrf.mxu2 }
 0x1bb   :  { %v209_v59 = vadd.f32 %v241_v57, %v208_v58 }
 0x1bd   :  { %v211_v60 = vmax.f32 %v209_v59, 0.0 }
 0x1bf   :  { %212 = vst [vmem:[#allocation10] sm:$0xff] %v211_v60 }
 0x1c0   :  { %223 = dma.vmem_to_hbm [thread:$0]  %s219_s25, 128, %s221_s28, [#allocation4]  }
 0x1c1   :  { %368 = dma.done.wait [#allocation4], 128  }
 0x1c2   :  { %369 = vsyncadd [#allocation4], 4294967168 }
 0x1c3   :  { %228 = vsyncpa [#allocation3], 1 }
 0x1c4   :  { %229 = vsyncpa [#allocation6], 1 }
 0x1c5   :  { %230 = vsyncpa [#allocation9], 1 }
 0x1c6   :  { %231 = vsyncpa [#allocation4], 1 }

</bundles_post_ra>
